<compile_context>
chip_gen: v5e
topology: v5e:2x2
jax: 0.10.0
libtpu: 0.0.40
codegen_flags: <defaults>
</compile_context>

<pallas_src>
import jax
import jax.numpy as jnp
from jax import lax
from jax.experimental import pallas as pl
from jax.experimental.pallas import tpu as pltpu


# --------------------------------------------------------------------------- #
# 1. one-shot selection pass: argmax indices + one-hot selection matrix        #
#    (matches torch.argmax tie-breaking = first occurrence, NaN treated as max)#
# --------------------------------------------------------------------------- #
def _selection_kernel(logits_ref, idx_ref, sel_ref):
    logits = logits_ref[...]                                   # (K, D) f32
    K, D = logits.shape
    mx = jnp.max(logits, axis=1, keepdims=True)                # (K, 1)
    col = lax.broadcasted_iota(jnp.int32, (K, D), 1)           # (K, D)
    # torch.argmax treats NaN as the maximum; for a NaN row `logits == mx` is all-False,
    # so add an isnan hit to select the first NaN position instead.
    hit = (logits == mx) | jnp.isnan(logits)
    cand = jnp.where(hit, col, jnp.int32(D))                   # sentinel never survives
    idx = jnp.min(cand, axis=1, keepdims=True)                 # (K, 1) first occurrence
    idx_ref[...] = idx
    sel_ref[...] = (col == idx).astype(sel_ref.dtype)          # (K, D) one-hot


def _selection(logits: jax.Array, sel_dtype) -> tuple[jax.Array, jax.Array]:
    K, D = logits.shape
    idx, sel = pl.pallas_call(
        _selection_kernel,
        out_shape=(jax.ShapeDtypeStruct((K, 1), jnp.int32),
                   jax.ShapeDtypeStruct((K, D), sel_dtype)),
        in_specs=[pl.BlockSpec((K, D), lambda: (0, 0))],
        out_specs=(pl.BlockSpec((K, 1), lambda: (0, 0)),
                   pl.BlockSpec((K, D), lambda: (0, 0))),
    )(logits)
    return idx, sel


# --------------------------------------------------------------------------- #
# 2. batch-gridded selection matmul: out_tile = x_tile @ sel.T -> (TB, K)      #
# --------------------------------------------------------------------------- #
def _select_matmul_kernel(sel_ref, x_ref, out_ref):
    # sel_ref: (K, D) one-hot, resident (constant index_map); x_ref: (TB, D); out: (TB, K)
    out_ref[...] = lax.dot_general(
        x_ref[...], sel_ref[...],
        dimension_numbers=(((1,), (1,)), ((), ())),            # x @ sel.T (small RHS transposed)
        preferred_element_type=jnp.float32,
    ).astype(out_ref.dtype)


def _vmem_capacity_bytes() -> int:
    try:
        return int(pltpu.get_tpu_info().vmem_capacity_bytes)
    except Exception:
        return 64 * 1024 * 1024            # conservative default = v7x per-TensorCore VMEM


def _round_up(v: int, m: int) -> int:
    return ((v + m - 1) // m) * m


def _buffer_bytes(tb: int, d: int, k: int) -> int:
    # double-buffered x (TB, D) and out (TB, K) tiles + double-buffered (K, D) selection
    # matrix + compiler scratch headroom
    return 4 * (2 * tb * (d + k) + 2 * k * d) + (2 << 20)


def _pick_batch_tile(b: int, d: int, k: int, vmem_cap: int) -> int:
    budget = int(0.70 * vmem_cap)
    if b < 256:
        return b                           # single small tile; full-dim block always legal
    # aim for >= 2 grid steps (both v7x TensorCores get work) with the largest
    # 128-aligned tile that fits the VMEM budget
    half = _round_up((b + 1) // 2, 128)
    for tb in (2048, 1024, 512, 256, 128):
        if tb <= half and _buffer_bytes(tb, d, k) <= budget:
            return tb
    # TODO(synk): for extreme input_size add an inner "arbitrary" D grid axis with a
    #             (TB, K) f32 accumulator instead of shrinking the batch tile this far.
    return 8


def encoder_forward(x: jax.Array, logits: jax.Array, *, batch_tile=None) -> jax.Array:
    """Eval-mode forward of the concrete-autoencoder Encoder.

    x:      (batch, input_size)
    logits: (output_size, input_size)
    returns (batch, output_size)
    """
    B, D = x.shape
    K, D2 = logits.shape
    assert D == D2, "input_size mismatch between x and logits"

    _, sel = _selection(logits, x.dtype)                       # hoisted argmax + one-hot

    vmem_cap = _vmem_capacity_bytes()
    TB = batch_tile if batch_tile is not None else _pick_batch_tile(B, D, K, vmem_cap)
    nb = pl.cdiv(B, TB)

    need = _buffer_bytes(TB, D, K)
    vmem_limit = int(min(int(0.85 * vmem_cap),
                         max(32 * 1024 * 1024, int(1.3 * need))))

    # TODO(synk): if a trace on v5e shows exposed DMA, try pipeline_mode=pl.Buffered(3)
    #             on the x BlockSpec (lowest HBM bandwidth generation).
    out = pl.pallas_call(
        _select_matmul_kernel,
        out_shape=jax.ShapeDtypeStruct((B, K), x.dtype),
        grid=(nb,),
        in_specs=[
            pl.BlockSpec((K, D), lambda i: (0, 0)),            # selection matrix, resident
            pl.BlockSpec((TB, D), lambda i: (i, 0)),           # x batch tile (pipelined)
        ],
        out_specs=pl.BlockSpec((TB, K), lambda i: (i, 0)),     # (B, K) directly, no transpose
        compiler_params=pltpu.CompilerParams(
            dimension_semantics=("parallel",),
            vmem_limit_bytes=vmem_limit,
        ),
    )(sel, x)
    return out


# --------------------------------------------------------------------------- #
# 3. alternative: scalar-prefetched row gather (input_size >> output_size AND  #
#    the data is already stored feature-major)                                 #
# --------------------------------------------------------------------------- #
def _gather_rows_kernel(idx_ref, xT_ref, out_ref):
    del idx_ref                                                # only used in the index_maps
    out_ref[...] = xT_ref[...]


def encoder_forward_gather(x_feature_major: jax.Array, logits: jax.Array) -> jax.Array:
    """Row-gather formulation: DMAs only the K selected feature rows (no MXU).

    Expects x in feature-major layout (input_size, batch).  Use this path ONLY when the
    data already lives feature-major: transposing x just to call it would cost more HBM
    traffic than the matmul path saves.
    """
    D, B = x_feature_major.shape
    K, D2 = logits.shape
    assert D == D2, "input_size mismatch between x and logits"

    idx, _ = _selection(logits, x_feature_major.dtype)
    idx = idx.reshape(K)                                       # (K,) int32 scalar-prefetch arg
    xT = x_feature_major.reshape(D, 1, B)                      # unit middle dim keeps the
                                                               # (8,128) block rule trivially met
    TB = B if B <= 2048 else 2048                              # full dim or multiple of 128
    nb = pl.cdiv(B, TB)

    out = pl.pallas_call(
        _gather_rows_kernel,
        out_shape=jax.ShapeDtypeStruct((K, 1, B), x_feature_major.dtype),
        grid_spec=pltpu.PrefetchScalarGridSpec(
            num_scalar_prefetch=1,
            grid=(nb, K),                                      # batch axis first -> megacore
            in_specs=[pl.BlockSpec((1, 1, TB),
                                   lambda b, k, idx_ref: (idx_ref[k], 0, b))],
            out_specs=pl.BlockSpec((1, 1, TB),
                                   lambda b, k, idx_ref: (k, 0, b)),
        ),
        compiler_params=pltpu.CompilerParams(
            dimension_semantics=("parallel", "arbitrary")),
    )(idx, xT)
    # TODO(synk): batch ~8 selected rows per grid step via manual make_async_copy from a
    #             pl.ANY HBM ref to amortize per-step DMA overhead when K is large.
    return jnp.transpose(out.reshape(K, B), (1, 0))            # (B, K) (tiny output transpose)


# --------------------------------------------------------------------------- #
# demo / self-check                                                            #
# --------------------------------------------------------------------------- #
def _xavier_normal(key, shape):
    # matches nn.init.xavier_normal_ for a 2-D tensor (fan_out, fan_in)
    fan_out, fan_in = shape
    std = (2.0 / (fan_in + fan_out)) ** 0.5
    return std * jax.random.normal(key, shape, dtype=jnp.float32)


if __name__ == "__main__":
    key = jax.random.PRNGKey(0)

    # (batch, input_size, output_size): toy case + a multi-tile case with a ragged edge
    for (B, D, K) in [(8, 32, 8), (300, 384, 16)]:
        key, k_logits, k_x = jax.random.split(key, 3)
        logits = _xavier_normal(k_logits, (K, D))
        x = jax.random.normal(k_x, (B, D), dtype=jnp.float32)

        # pure-JAX reference (eval branch of the PyTorch forward)
        sel_ref = jax.nn.one_hot(jnp.argmax(logits, axis=1), D, dtype=jnp.float32)
        ref = x @ sel_ref.T                                    # (B, K)

        out_mm = jax.block_until_ready(encoder_forward(x, logits))
        assert out_mm.shape == (B, K)
        assert jnp.allclose(out_mm, ref, atol=1e-5), f"matmul path mismatch at {(B, D, K)}"

        # gather path: data must already be feature-major; transpose here is test-only glue
        xT = jnp.asarray(x.T)
        out_g = jax.block_until_ready(encoder_forward_gather(xT, logits))
        assert out_g.shape == (B, K)
        assert jnp.allclose(out_g, ref, atol=1e-5), f"gather path mismatch at {(B, D, K)}"

    # TODO(synk): training branch (Gumbel-softmax sampling / temperature schedule),
    #             regularization() and update_temp() are training-time utilities and are
    #             not part of the eval forward pass implemented here.
    print("KERNEL_OK")
</pallas_src>

<mosaic_0001>
module attributes {stable_mosaic.version = 11 : i64} {
  func.func @_selection_kernel(%arg0: memref<8x32xf32, #tpu.memory_space<vmem>>, %arg1: memref<8x1xi32, #tpu.memory_space<vmem>>, %arg2: memref<8x32xf32, #tpu.memory_space<vmem>>) attributes {dimension_semantics = [], scalar_prefetch = 0 : i64, scratch_operands = 0 : i64, tpu.core_type = #tpu.core_type<tc>} {
    %c0 = arith.constant 0 : index
    %c0_0 = arith.constant 0 : index
    %0 = vector.load %arg0[%c0, %c0_0] : memref<8x32xf32, #tpu.memory_space<vmem>>, vector<8x32xf32>
    %cst = arith.constant dense<0xFF800000> : vector<8xf32>
    %1 = vector.multi_reduction <maximumf>, %0, %cst [1] : vector<8x32xf32> to vector<8xf32>
    %2 = vector.shape_cast %1 : vector<8xf32> to vector<8x1xf32>
    %3 = tpu.iota {dimensions = array<i32: 1>} : vector<8x32xi32>
    %4 = vector.broadcast %2 : vector<8x1xf32> to vector<8x32xf32>
    %5 = arith.cmpf oeq, %0, %4 : vector<8x32xf32>
    %6 = arith.cmpf one, %0, %0 : vector<8x32xf32>
    %7 = arith.ori %5, %6 : vector<8x32xi1>
    %c32_i32 = arith.constant 32 : i32
    %8 = vector.broadcast %c32_i32 : i32 to vector<8x32xi32>
    %9 = arith.select %7, %3, %8 : vector<8x32xi1>, vector<8x32xi32>
    %cst_1 = arith.constant dense<2147483647> : vector<8xi32>
    %10 = vector.multi_reduction <minsi>, %9, %cst_1 [1] : vector<8x32xi32> to vector<8xi32>
    %11 = vector.shape_cast %10 : vector<8xi32> to vector<8x1xi32>
    %c0_2 = arith.constant 0 : index
    %c0_3 = arith.constant 0 : index
    %12 = vector.load %arg1[%c0_2, %c0_3] : memref<8x1xi32, #tpu.memory_space<vmem>>, vector<8x1xi32>
    tpu.vector_store %arg1[%c0_2, %c0_3], %11 {strides = array<i32>} : memref<8x1xi32, #tpu.memory_space<vmem>>, vector<8x1xi32>,
    %13 = vector.broadcast %11 : vector<8x1xi32> to vector<8x32xi32>
    %14 = arith.cmpi eq, %3, %13 : vector<8x32xi32>
    %15 = arith.extui %14 : vector<8x32xi1> to vector<8x32xi32>
    %16 = arith.sitofp %15 : vector<8x32xi32> to vector<8x32xf32>
    %c0_4 = arith.constant 0 : index
    %c0_5 = arith.constant 0 : index
    %17 = vector.load %arg2[%c0_4, %c0_5] : memref<8x32xf32, #tpu.memory_space<vmem>>, vector<8x32xf32>
    tpu.vector_store %arg2[%c0_4, %c0_5], %16 {strides = array<i32>} : memref<8x32xf32, #tpu.memory_space<vmem>>, vector<8x32xf32>,
    return
  }
}

</mosaic_0001>

<bundles_post_ra>
// kernel: tpu_custom_call.1
= control target key start
LH: loop header
LB: loop body
LE: loop exit
PB: predicated region body
PF: predicated region fallthrough
CT: control target
= control target key end

     0   :  { %8 = vsyncpa [#allocation3], 0  ;;  %s164_s0 = inlined_call_operand.hbm [shape: f32[8,32], index: 0, kind: input, shape index: {}]   ;;  %s165_s1 = inlined_call_operand.vmem [shape: s32[8,1], index: 1, kind: output, shape index: {0}]   ;;  %s166_s2 = inlined_call_operand.hbm [shape: f32[8,32], index: 2, kind: output, shape index: {1}]  }
   0x1   :  { %9 = vsyncpa [#allocation4], 0  ;;  %s15_s11 = sshll.u32 %s164_s0, 4  ;;  %s134_s12 = smov [#allocation2]   ;;  %s16_s11 = int_to_ptr.hbm [resolvable:$true] %s15_s11 }
   0x2   :  { %s17_s13 = sshll.u32 %s134_s12, 4  ;;  %s18_s13 = int_to_ptr.vmem [resolvable:$true] %s17_s13 }
   0x3   :  { %20 = dma.hbm_to_vmem [thread:$0]  %s16_s11, 128, %s18_s13, [#allocation3]  }
   0x4   :  { %130 = dma.done.wait [#allocation3], 128  }
   0x5   :  { %131 = vsyncadd [#allocation3], 4294967168  ;;  %vm26_vm0 = vcmask 261120   ;;  %v25_v0 = vld [vmem:[#allocation2] sm:$0xff]  ;;  %v30_v2 = vlaneseq  ;;  %vm51_vm5 = vcmask 7168   ;;  %s135_s0 = smov [#allocation5]  }
   0x6   :  { %v27_v1 = vsel %vm26_vm0, %v25_v0, -inf  ;;  %vm33_vm1 = vcmp.ne.f32.partialorder %v25_v0, %v25_v0  ;;  %s64_s14 = sshll.u32 %s135_s0, 4  ;;  %s66_s17 = sshll.u32 %s166_s2, 4  ;;  %v136_v18 = vmov 0.0   ;;  %s65_s14 = int_to_ptr.vmem [resolvable:$true] %s64_s14  ;;  %s67_s17 = int_to_ptr.hbm [resolvable:$true] %s66_s17 }
   0x7   :  { %28 = vmax.xlane.f32.xlu0 %v27_v1  ;;  %v31_v3 = vand.u32 127, %v30_v2 }
  0x7a   :  { %v29_v4 = vpop.xlane.xlu0 %28 }
  0x7b   :  { %vm32_vm2 = vcmp.eq.f32.partialorder %v25_v0, %v29_v4 }
  0x7c   :  { %vm34_vm3 = vmor %vm32_vm2, %vm33_vm1 }
  0x7d   :  { %v35_v5 = vsel %vm34_vm3, %v31_v3, 32 }
  0x7e   :  { %v36_v6 = vsel %vm26_vm0, %v35_v5, 2147483647 }
  0x7f   :  { %v38_v7 = vshra.s32 %v36_v6, 16  ;;  %v37_v9 = vand.u32 65535, %v36_v6 }
  0x81   :  { %v40_v8 = vcvt.s32.f32 %v38_v7  ;;  %v39_v11 = vcvt.s32.f32 %v37_v9 }
  0x83   :  { %41 = vmin.xlane.f32.xlu0 %v40_v8 }
  0xf6   :  { %v42_v10 = vpop.xlane.xlu0 %41 }
  0xf7   :  { %vm43_vm4 = vcmp.eq.f32.partialorder %v40_v8, %v42_v10  ;;  %v48_v13 = vcvt.f32.s32 %v42_v10 }
  0xf8   :  { %v44_v12 = vsel %vm43_vm4, %v39_v11, inf }
  0xf9   :  { %45 = vmin.xlane.f32.xlu1 %v44_v12  ;;  %v49_v15 = vshll.u32 %v48_v13, 16 }
 0x16c   :  { %v46_v14 = vpop.xlane.xlu1 %45 }
 0x16d   :  { %v47_v16 = vcvt.f32.s32 %v46_v14 }
 0x16f   :  { %v50_v17 = vadd.s32 %v49_v15, %v47_v16 }
 0x171   :  { %52 = vst.msk [vmem:[%s165_s1] sm:$0xff] %vm51_vm5, %v50_v17  ;;  %vm53_vm6 = vcmp.eq.s32.totalorder %v31_v3, %v50_v17 }
 0x172   :  { %v78_v19 = vsel %vm53_vm6, 1.0, %v136_v18 }
 0x173   :  { %56 = vst.msk [vmem:[#allocation5] sm:$0xff] %vm26_vm0, %v78_v19 }
 0x174   :  { %69 = dma.vmem_to_hbm [thread:$0]  %s65_s14, 128, %s67_s17, [#allocation4]  }
 0x175   :  { %132 = dma.done.wait [#allocation4], 128  }
 0x176   :  { %133 = vsyncadd [#allocation4], 4294967168 }
 0x177   :  { %76 = vsyncpa [#allocation3], 1 }
 0x178   :  { %77 = vsyncpa [#allocation4], 1 }

</bundles_post_ra>
